<compile_context>
chip_gen: v5e
topology: v5e:2x2
jax: 0.10.0
libtpu: 0.0.40
codegen_flags: <defaults>
</compile_context>

<pallas_src>
import jax
import jax.numpy as jnp
from jax.experimental import pallas as pl
from jax.experimental.pallas import tpu as pltpu

EPS = 1e-5


def bottleneck_forward(x_nchw, gamma1, beta1, w1_oihw, gamma2, beta2, w2_oihw):
    """x_nchw: (N, Cin, H, W). Returns (N, Cin + growth, H, W)."""
    N, Cin, H, W = x_nchw.shape
    inner = w1_oihw.shape[0]
    G = w2_oihw.shape[0]
    HW = H * W
    inv_count = 1.0 / float(N * HW)

    # ---- channel-major operands (spatial axis -> lanes) -------------------
    x = x_nchw.reshape(N, Cin, HW).astype(jnp.float32)            # (N, Cin, HW)
    g1 = gamma1.reshape(Cin, 1).astype(jnp.float32)
    b1 = beta1.reshape(Cin, 1).astype(jnp.float32)
    w1 = w1_oihw[:, :, 0, 0].astype(jnp.bfloat16)                 # (inner, Cin)
    g2 = gamma2.reshape(inner, 1).astype(jnp.float32)
    b2 = beta2.reshape(inner, 1).astype(jnp.float32)
    # (G, c, kh, kw) -> (G, kh, kw, c) -> (G, 9*inner); matches im2col slab order.
    w2 = jnp.transpose(w2_oihw, (0, 2, 3, 1)).reshape(G, 9 * inner)
    w2 = w2.astype(jnp.bfloat16)

    # -----------------------------------------------------------------------
    # Stage 1: BN1 batch stats -> BN1 + ReLU -> 1x1 conv -> BN2 batch stats.
    # grid = (phase, batch); VMEM scratch accumulators carry cross-batch sums.
    # -----------------------------------------------------------------------
    def stage1_kernel(x_ref, g1_ref, b1_ref, w1_ref, g2_ref, b2_ref,
                      y1_ref, ss2_ref, s1, q1, s2, q2):
        phase = pl.program_id(0)
        n = pl.program_id(1)
        n_last = pl.num_programs(1) - 1

        @pl.when(jnp.logical_and(phase == 0, n == 0))
        def _init():
            s1[...] = jnp.zeros_like(s1)
            q1[...] = jnp.zeros_like(q1)
            s2[...] = jnp.zeros_like(s2)
            q2[...] = jnp.zeros_like(q2)

        @pl.when(phase == 0)
        def _bn1_stats():
            # single traversal: accumulate sum and sum-of-squares together
            xc = x_ref[0]                                         # (Cin, HW)
            s1[...] += jnp.sum(xc, axis=1, keepdims=True)
            q1[...] += jnp.sum(xc * xc, axis=1, keepdims=True)

        @pl.when(phase == 1)
        def _bn1_relu_conv1():
            xc = x_ref[0]                                         # (Cin, HW)
            mean1 = s1[...] * inv_count
            var1 = q1[...] * inv_count - mean1 * mean1
            scale1 = g1_ref[...] * jax.lax.rsqrt(var1 + EPS)
            shift1 = b1_ref[...] - mean1 * scale1
            h1 = jnp.maximum(xc * scale1 + shift1, 0.0)           # f32, lane-dense
            # 1x1 conv == matmul over channels (bf16 operands, f32 accumulation)
            y1 = jnp.dot(w1_ref[...], h1.astype(jnp.bfloat16),
                         preferred_element_type=jnp.float32)      # (inner, HW)
            y1_ref[0] = y1
            s2[...] += jnp.sum(y1, axis=1, keepdims=True)
            q2[...] += jnp.sum(y1 * y1, axis=1, keepdims=True)

        @pl.when(jnp.logical_and(phase == 1, n == n_last))
        def _bn2_finalize():
            mean2 = s2[...] * inv_count
            var2 = q2[...] * inv_count - mean2 * mean2
            scale2 = g2_ref[...] * jax.lax.rsqrt(var2 + EPS)
            shift2 = b2_ref[...] - mean2 * scale2
            ss2_ref[:, 0:1] = scale2
            ss2_ref[:, 1:2] = shift2

    y1, ss2 = pl.pallas_call(
        stage1_kernel,
        grid=(2, N),
        in_specs=[
            pl.BlockSpec((1, Cin, HW), lambda p, n: (n, 0, 0)),
            pl.BlockSpec((Cin, 1), lambda p, n: (0, 0)),
            pl.BlockSpec((Cin, 1), lambda p, n: (0, 0)),
            pl.BlockSpec((inner, Cin), lambda p, n: (0, 0)),
            pl.BlockSpec((inner, 1), lambda p, n: (0, 0)),
            pl.BlockSpec((inner, 1), lambda p, n: (0, 0)),
        ],
        out_specs=(
            pl.BlockSpec((1, inner, HW), lambda p, n: (n, 0, 0)),
            pl.BlockSpec((inner, 2), lambda p, n: (0, 0)),
        ),
        out_shape=(
            jax.ShapeDtypeStruct((N, inner, HW), jnp.float32),
            jax.ShapeDtypeStruct((inner, 2), jnp.float32),
        ),
        scratch_shapes=[
            pltpu.VMEM((Cin, 1), jnp.float32),     # sum(x)
            pltpu.VMEM((Cin, 1), jnp.float32),     # sum(x^2)
            pltpu.VMEM((inner, 1), jnp.float32),   # sum(y1)
            pltpu.VMEM((inner, 1), jnp.float32),   # sum(y1^2)
        ],
        compiler_params=pltpu.CompilerParams(
            dimension_semantics=("arbitrary", "arbitrary"),
            vmem_limit_bytes=32 * 1024 * 1024),
    )(x, g1, b1, w1, g2, b2)

    # -----------------------------------------------------------------------
    # Stage 2: BN2 + ReLU + 3x3 conv (padding=1) as one im2col matmul.
    # Independent per image -> "parallel" grid axis (v7x megacore).
    # -----------------------------------------------------------------------
    def stage2_kernel(y1_ref, ss2_ref, w2_ref, out_ref):
        y1c = y1_ref[0]                                           # (inner, HW)
        scale2 = ss2_ref[:, 0:1]
        shift2 = ss2_ref[:, 1:2]
        h2 = jnp.maximum(y1c * scale2 + shift2, 0.0)              # f32, lane-dense

        # flattened pixel index -> (row, col) for border masking
        pidx = jax.lax.broadcasted_iota(jnp.int32, (1, HW), 1)
        prow = pidx // W
        pcol = pidx % W

        # zero-pad (W+1) lanes each side so every conv tap is a static lane
        # slice of h2p (flattened-spatial SAME padding, zeroed only once).
        zpad = jnp.zeros((inner, W + 1), jnp.float32)
        h2p = jnp.concatenate([zpad, h2, zpad], axis=1)           # (inner, HW+2W+2)

        taps = []
        for kh in range(3):
            for kw in range(3):
                dh, dw = kh - 1, kw - 1
                s = dh * W + dw
                shifted = h2p[:, (W + 1) + s:(W + 1) + s + HW]    # (inner, HW)
                valid = ((prow + dh >= 0) & (prow + dh < H) &
                         (pcol + dw >= 0) & (pcol + dw < W))
                taps.append(jnp.where(valid, shifted, 0.0).astype(jnp.bfloat16))
        slab = jnp.concatenate(taps, axis=0)                      # (9*inner, HW)

        # single MXU contraction: K = 9*inner, lane-dense (G, HW) output
        out_ref[0] = jnp.dot(w2_ref[...], slab,
                             preferred_element_type=jnp.float32)

    feats = pl.pallas_call(
        stage2_kernel,
        grid=(N,),
        in_specs=[
            pl.BlockSpec((1, inner, HW), lambda n: (n, 0, 0)),
            pl.BlockSpec((inner, 2), lambda n: (0, 0)),
            pl.BlockSpec((G, 9 * inner), lambda n: (0, 0)),
        ],
        out_specs=pl.BlockSpec((1, G, HW), lambda n: (n, 0, 0)),
        out_shape=jax.ShapeDtypeStruct((N, G, HW), jnp.float32),
        compiler_params=pltpu.CompilerParams(
            dimension_semantics=("parallel",),
            vmem_limit_bytes=32 * 1024 * 1024),
    )(y1, ss2, w2)

    feats = feats.reshape(N, G, H, W).astype(x_nchw.dtype)
    # identity path stays out of the kernels: concat handled by XLA
    return jnp.concatenate([x_nchw, feats], axis=1)


def reference(x_nchw, gamma1, beta1, w1, gamma2, beta2, w2):
    """Pure-JAX (f32) reference mirroring the PyTorch module (training-mode BN)."""
    def bn(x, g, b):
        m = jnp.mean(x, axis=(0, 2, 3), keepdims=True)
        v = jnp.mean((x - m) ** 2, axis=(0, 2, 3), keepdims=True)
        return (x - m) * jax.lax.rsqrt(v + EPS) * g[None, :, None, None] \
            + b[None, :, None, None]

    h = jax.nn.relu(bn(x_nchw, gamma1, beta1))
    y1 = jax.lax.conv_general_dilated(
        h, w1, (1, 1), 'VALID', dimension_numbers=('NCHW', 'OIHW', 'NCHW'))
    h2 = jax.nn.relu(bn(y1, gamma2, beta2))
    y2 = jax.lax.conv_general_dilated(
        h2, w2, (1, 1), ((1, 1), (1, 1)),
        dimension_numbers=('NCHW', 'OIHW', 'NCHW'))
    return jnp.concatenate([x_nchw, y2], axis=1)


if __name__ == "__main__":
    key = jax.random.PRNGKey(0)
    k_x, k_g1, k_b1, k_w1, k_g2, k_b2, k_w2 = jax.random.split(key, 7)

    # Bottleneck(in_channels=4, growth_rate=8)
    N, Cin, H, W = 2, 4, 16, 16
    growth = 8
    inner = 4 * growth

    x = jax.random.normal(k_x, (N, Cin, H, W), jnp.float32)
    gamma1 = 1.0 + 0.1 * jax.random.normal(k_g1, (Cin,), jnp.float32)
    beta1 = 0.1 * jax.random.normal(k_b1, (Cin,), jnp.float32)
    w1 = 0.1 * jax.random.normal(k_w1, (inner, Cin, 1, 1), jnp.float32)     # OIHW
    gamma2 = 1.0 + 0.1 * jax.random.normal(k_g2, (inner,), jnp.float32)
    beta2 = 0.1 * jax.random.normal(k_b2, (inner,), jnp.float32)
    w2 = 0.1 * jax.random.normal(k_w2, (growth, inner, 3, 3), jnp.float32)  # OIHW

    out = bottleneck_forward(x, gamma1, beta1, w1, gamma2, beta2, w2)
    out = jax.block_until_ready(out)

    ref = reference(x, gamma1, beta1, w1, gamma2, beta2, w2)
    assert out.shape == (N, Cin + growth, H, W), out.shape
    # bf16 MXU operands (with f32 accumulation) => looser tolerance vs. the
    # pure-f32 reference.
    max_err = float(jnp.max(jnp.abs(out - ref)))
    assert jnp.allclose(out, ref, atol=5e-2, rtol=5e-2), max_err

    print("KERNEL_OK")
</pallas_src>

<mosaic_0001>
module attributes {stable_mosaic.version = 11 : i64} {
  func.func @stage1_kernel(%arg0: i32, %arg1: i32, %arg2: memref<1x4x256xf32, #tpu.memory_space<vmem>>, %arg3: memref<4x1xf32, #tpu.memory_space<vmem>>, %arg4: memref<4x1xf32, #tpu.memory_space<vmem>>, %arg5: memref<32x4xbf16, #tpu.memory_space<vmem>>, %arg6: memref<32x1xf32, #tpu.memory_space<vmem>>, %arg7: memref<32x1xf32, #tpu.memory_space<vmem>>, %arg8: memref<1x32x256xf32, #tpu.memory_space<vmem>>, %arg9: memref<32x2xf32, #tpu.memory_space<vmem>>, %arg10: memref<4x1xf32, #tpu.memory_space<vmem>>, %arg11: memref<4x1xf32, #tpu.memory_space<vmem>>, %arg12: memref<32x1xf32, #tpu.memory_space<vmem>>, %arg13: memref<32x1xf32, #tpu.memory_space<vmem>>) attributes {dimension_semantics = [#tpu.dimension_semantics<arbitrary>, #tpu.dimension_semantics<arbitrary>], iteration_bounds = array<i64: 2, 2>, scalar_prefetch = 0 : i64, scratch_operands = 4 : i64, tpu.core_type = #tpu.core_type<tc>, window_params = [{transform_indices = @transform_0, window_bounds = array<i64: 1, 4, 256>}, {pipeline_mode = #tpu.pipeline_mode<synchronous>, transform_indices = @transform_1, window_bounds = array<i64: 4, 1>}, {pipeline_mode = #tpu.pipeline_mode<synchronous>, transform_indices = @transform_2, window_bounds = array<i64: 4, 1>}, {pipeline_mode = #tpu.pipeline_mode<synchronous>, transform_indices = @transform_3, window_bounds = array<i64: 32, 4>}, {pipeline_mode = #tpu.pipeline_mode<synchronous>, transform_indices = @transform_4, window_bounds = array<i64: 32, 1>}, {pipeline_mode = #tpu.pipeline_mode<synchronous>, transform_indices = @transform_5, window_bounds = array<i64: 32, 1>}, {transform_indices = @transform_6, window_bounds = array<i64: 1, 32, 256>}, {pipeline_mode = #tpu.pipeline_mode<synchronous>, transform_indices = @transform_7, window_bounds = array<i64: 32, 2>}]} {
    %c0_i32 = arith.constant 0 : i32
    %0 = arith.cmpi eq, %arg0, %c0_i32 : i32
    %c0_i32_0 = arith.constant 0 : i32
    %1 = arith.cmpi eq, %arg1, %c0_i32_0 : i32
    %2 = arith.andi %0, %1 : i1
    %3 = arith.extui %2 : i1 to i32
    %c0_i32_1 = arith.constant 0 : i32
    %4 = arith.cmpi ne, %3, %c0_i32_1 : i32
    scf.if %4 {
      %cst = arith.constant 0.000000e+00 : f32
      %16 = vector.broadcast %cst : f32 to vector<4x1xf32>
      %c0 = arith.constant 0 : index
      %c0_8 = arith.constant 0 : index
      %17 = vector.load %arg10[%c0, %c0_8] : memref<4x1xf32, #tpu.memory_space<vmem>>, vector<4x1xf32>
      tpu.vector_store %arg10[%c0, %c0_8], %16 {strides = array<i32>} : memref<4x1xf32, #tpu.memory_space<vmem>>, vector<4x1xf32>,
      %cst_9 = arith.constant 0.000000e+00 : f32
      %18 = vector.broadcast %cst_9 : f32 to vector<4x1xf32>
      %c0_10 = arith.constant 0 : index
      %c0_11 = arith.constant 0 : index
      %19 = vector.load %arg11[%c0_10, %c0_11] : memref<4x1xf32, #tpu.memory_space<vmem>>, vector<4x1xf32>
      tpu.vector_store %arg11[%c0_10, %c0_11], %18 {strides = array<i32>} : memref<4x1xf32, #tpu.memory_space<vmem>>, vector<4x1xf32>,
      %cst_12 = arith.constant 0.000000e+00 : f32
      %20 = vector.broadcast %cst_12 : f32 to vector<32x1xf32>
      %c0_13 = arith.constant 0 : index
      %c0_14 = arith.constant 0 : index
      %21 = vector.load %arg12[%c0_13, %c0_14] : memref<32x1xf32, #tpu.memory_space<vmem>>, vector<32x1xf32>
      tpu.vector_store %arg12[%c0_13, %c0_14], %20 {strides = array<i32>} : memref<32x1xf32, #tpu.memory_space<vmem>>, vector<32x1xf32>,
      %cst_15 = arith.constant 0.000000e+00 : f32
      %22 = vector.broadcast %cst_15 : f32 to vector<32x1xf32>
      %c0_16 = arith.constant 0 : index
      %c0_17 = arith.constant 0 : index
      %23 = vector.load %arg13[%c0_16, %c0_17] : memref<32x1xf32, #tpu.memory_space<vmem>>, vector<32x1xf32>
      tpu.vector_store %arg13[%c0_16, %c0_17], %22 {strides = array<i32>} : memref<32x1xf32, #tpu.memory_space<vmem>>, vector<32x1xf32>,
    } else {
    }
    %c0_i32_2 = arith.constant 0 : i32
    %5 = arith.cmpi eq, %arg0, %c0_i32_2 : i32
    %6 = arith.extui %5 : i1 to i32
    %c0_i32_3 = arith.constant 0 : i32
    %7 = arith.cmpi ne, %6, %c0_i32_3 : i32
    scf.if %7 {
      %c0 = arith.constant 0 : index
      %c0_8 = arith.constant 0 : index
      %c0_9 = arith.constant 0 : index
      %16 = vector.load %arg2[%c0, %c0_8, %c0_9] : memref<1x4x256xf32, #tpu.memory_space<vmem>>, vector<1x4x256xf32>
      %17 = vector.shape_cast %16 : vector<1x4x256xf32> to vector<4x256xf32>
      %c0_10 = arith.constant 0 : index
      %c0_11 = arith.constant 0 : index
      %18 = vector.load %arg10[%c0_10, %c0_11] : memref<4x1xf32, #tpu.memory_space<vmem>>, vector<4x1xf32>
      %cst = arith.constant dense<0.000000e+00> : vector<4xf32>
      %19 = vector.multi_reduction <add>, %17, %cst [1] : vector<4x256xf32> to vector<4xf32>
      %20 = vector.shape_cast %19 : vector<4xf32> to vector<4x1xf32>
      %21 = arith.addf %18, %20 : vector<4x1xf32>
      %c0_12 = arith.constant 0 : index
      %c0_13 = arith.constant 0 : index
      %22 = vector.load %arg10[%c0_12, %c0_13] : memref<4x1xf32, #tpu.memory_space<vmem>>, vector<4x1xf32>
      tpu.vector_store %arg10[%c0_12, %c0_13], %21 {strides = array<i32>} : memref<4x1xf32, #tpu.memory_space<vmem>>, vector<4x1xf32>,
      %c0_14 = arith.constant 0 : index
      %c0_15 = arith.constant 0 : index
      %23 = vector.load %arg11[%c0_14, %c0_15] : memref<4x1xf32, #tpu.memory_space<vmem>>, vector<4x1xf32>
      %24 = arith.mulf %17, %17 : vector<4x256xf32>
      %cst_16 = arith.constant dense<0.000000e+00> : vector<4xf32>
      %25 = vector.multi_reduction <add>, %24, %cst_16 [1] : vector<4x256xf32> to vector<4xf32>
      %26 = vector.shape_cast %25 : vector<4xf32> to vector<4x1xf32>
      %27 = arith.addf %23, %26 : vector<4x1xf32>
      %c0_17 = arith.constant 0 : index
      %c0_18 = arith.constant 0 : index
      %28 = vector.load %arg11[%c0_17, %c0_18] : memref<4x1xf32, #tpu.memory_space<vmem>>, vector<4x1xf32>
      tpu.vector_store %arg11[%c0_17, %c0_18], %27 {strides = array<i32>} : memref<4x1xf32, #tpu.memory_space<vmem>>, vector<4x1xf32>,
    } else {
    }
    %c1_i32 = arith.constant 1 : i32
    %8 = arith.cmpi eq, %arg0, %c1_i32 : i32
    %9 = arith.extui %8 : i1 to i32
    %c0_i32_4 = arith.constant 0 : i32
    %10 = arith.cmpi ne, %9, %c0_i32_4 : i32
    scf.if %10 {
      %c0 = arith.constant 0 : index
      %c0_8 = arith.constant 0 : index
      %c0_9 = arith.constant 0 : index
      %16 = vector.load %arg2[%c0, %c0_8, %c0_9] : memref<1x4x256xf32, #tpu.memory_space<vmem>>, vector<1x4x256xf32>
      %17 = vector.shape_cast %16 : vector<1x4x256xf32> to vector<4x256xf32>
      %c0_10 = arith.constant 0 : index
      %c0_11 = arith.constant 0 : index
      %18 = vector.load %arg10[%c0_10, %c0_11] : memref<4x1xf32, #tpu.memory_space<vmem>>, vector<4x1xf32>
      %cst = arith.constant 0.001953125 : f32
      %19 = vector.broadcast %cst : f32 to vector<4x1xf32>
      %20 = arith.mulf %18, %19 : vector<4x1xf32>
      %c0_12 = arith.constant 0 : index
      %c0_13 = arith.constant 0 : index
      %21 = vector.load %arg11[%c0_12, %c0_13] : memref<4x1xf32, #tpu.memory_space<vmem>>, vector<4x1xf32>
      %cst_14 = arith.constant 0.001953125 : f32
      %22 = vector.broadcast %cst_14 : f32 to vector<4x1xf32>
      %23 = arith.mulf %21, %22 : vector<4x1xf32>
      %24 = arith.mulf %20, %20 : vector<4x1xf32>
      %25 = arith.subf %23, %24 : vector<4x1xf32>
      %c0_15 = arith.constant 0 : index
      %c0_16 = arith.constant 0 : index
      %26 = vector.load %arg3[%c0_15, %c0_16] : memref<4x1xf32, #tpu.memory_space<vmem>>, vector<4x1xf32>
      %cst_17 = arith.constant 9.99999974E-6 : f32
      %27 = vector.broadcast %cst_17 : f32 to vector<4x1xf32>
      %28 = arith.addf %25, %27 : vector<4x1xf32>
      %29 = math.rsqrt %28 : vector<4x1xf32>
      %30 = arith.mulf %26, %29 : vector<4x1xf32>
      %c0_18 = arith.constant 0 : index
      %c0_19 = arith.constant 0 : index
      %31 = vector.load %arg4[%c0_18, %c0_19] : memref<4x1xf32, #tpu.memory_space<vmem>>, vector<4x1xf32>
      %32 = arith.mulf %20, %30 : vector<4x1xf32>
      %33 = arith.subf %31, %32 : vector<4x1xf32>
      %34 = vector.broadcast %30 : vector<4x1xf32> to vector<4x256xf32>
      %35 = arith.mulf %17, %34 : vector<4x256xf32>
      %36 = vector.broadcast %33 : vector<4x1xf32> to vector<4x256xf32>
      %37 = arith.addf %35, %36 : vector<4x256xf32>
      %cst_20 = arith.constant 0.000000e+00 : f32
      %38 = vector.broadcast %cst_20 : f32 to vector<4x256xf32>
      %39 = arith.maximumf %37, %38 : vector<4x256xf32>
      %c0_21 = arith.constant 0 : index
      %c0_22 = arith.constant 0 : index
      %40 = vector.load %arg5[%c0_21, %c0_22] : memref<32x4xbf16, #tpu.memory_space<vmem>>, vector<32x4xbf16>
      %41 = arith.truncf %39 : vector<4x256xf32> to vector<4x256xbf16>
      %cst_23 = arith.constant dense<0.000000e+00> : vector<32x256xf32>
      %42 = tpu.matmul %40, %41, %cst_23 {dimension_numbers = #tpu.dot_dimension_numbers<[1], [0], [0], [1], [0, 0, 1, 1], [], []>} : vector<32x4xbf16>, vector<4x256xbf16>, vector<32x256xf32> -> vector<32x256xf32>
      %c0_24 = arith.constant 0 : index
      %c0_25 = arith.constant 0 : index
      %c0_26 = arith.constant 0 : index
      %43 = vector.load %arg8[%c0_24, %c0_25, %c0_26] : memref<1x32x256xf32, #tpu.memory_space<vmem>>, vector<1x32x256xf32>
      %44 = vector.shape_cast %43 : vector<1x32x256xf32> to vector<32x256xf32>
      %45 = vector.shape_cast %42 : vector<32x256xf32> to vector<1x32x256xf32>
      tpu.vector_store %arg8[%c0_24, %c0_25, %c0_26], %45 {strides = array<i32>} : memref<1x32x256xf32, #tpu.memory_space<vmem>>, vector<1x32x256xf32>,
      %c0_27 = arith.constant 0 : index
      %c0_28 = arith.constant 0 : index
      %46 = vector.load %arg12[%c0_27, %c0_28] : memref<32x1xf32, #tpu.memory_space<vmem>>, vector<32x1xf32>
      %cst_29 = arith.constant dense<0.000000e+00> : vector<32xf32>
      %47 = vector.multi_reduction <add>, %42, %cst_29 [1] : vector<32x256xf32> to vector<32xf32>
      %48 = vector.shape_cast %47 : vector<32xf32> to vector<32x1xf32>
      %49 = arith.addf %46, %48 : vector<32x1xf32>
      %c0_30 = arith.constant 0 : index
      %c0_31 = arith.constant 0 : index
      %50 = vector.load %arg12[%c0_30, %c0_31] : memref<32x1xf32, #tpu.memory_space<vmem>>, vector<32x1xf32>
      tpu.vector_store %arg12[%c0_30, %c0_31], %49 {strides = array<i32>} : memref<32x1xf32, #tpu.memory_space<vmem>>, vector<32x1xf32>,
      %c0_32 = arith.constant 0 : index
      %c0_33 = arith.constant 0 : index
      %51 = vector.load %arg13[%c0_32, %c0_33] : memref<32x1xf32, #tpu.memory_space<vmem>>, vector<32x1xf32>
      %52 = arith.mulf %42, %42 : vector<32x256xf32>
      %cst_34 = arith.constant dense<0.000000e+00> : vector<32xf32>
      %53 = vector.multi_reduction <add>, %52, %cst_34 [1] : vector<32x256xf32> to vector<32xf32>
      %54 = vector.shape_cast %53 : vector<32xf32> to vector<32x1xf32>
      %55 = arith.addf %51, %54 : vector<32x1xf32>
      %c0_35 = arith.constant 0 : index
      %c0_36 = arith.constant 0 : index
      %56 = vector.load %arg13[%c0_35, %c0_36] : memref<32x1xf32, #tpu.memory_space<vmem>>, vector<32x1xf32>
      tpu.vector_store %arg13[%c0_35, %c0_36], %55 {strides = array<i32>} : memref<32x1xf32, #tpu.memory_space<vmem>>, vector<32x1xf32>,
    } else {
    }
    %c1_i32_5 = arith.constant 1 : i32
    %11 = arith.cmpi eq, %arg0, %c1_i32_5 : i32
    %c1_i32_6 = arith.constant 1 : i32
    %12 = arith.cmpi eq, %arg1, %c1_i32_6 : i32
    %13 = arith.andi %11, %12 : i1
    %14 = arith.extui %13 : i1 to i32
    %c0_i32_7 = arith.constant 0 : i32
    %15 = arith.cmpi ne, %14, %c0_i32_7 : i32
    scf.if %15 {
      %c0 = arith.constant 0 : index
      %c0_8 = arith.constant 0 : index
      %16 = vector.load %arg12[%c0, %c0_8] : memref<32x1xf32, #tpu.memory_space<vmem>>, vector<32x1xf32>
      %cst = arith.constant 0.001953125 : f32
      %17 = vector.broadcast %cst : f32 to vector<32x1xf32>
      %18 = arith.mulf %16, %17 : vector<32x1xf32>
      %c0_9 = arith.constant 0 : index
      %c0_10 = arith.constant 0 : index
      %19 = vector.load %arg13[%c0_9, %c0_10] : memref<32x1xf32, #tpu.memory_space<vmem>>, vector<32x1xf32>
      %cst_11 = arith.constant 0.001953125 : f32
      %20 = vector.broadcast %cst_11 : f32 to vector<32x1xf32>
      %21 = arith.mulf %19, %20 : vector<32x1xf32>
      %22 = arith.mulf %18, %18 : vector<32x1xf32>
      %23 = arith.subf %21, %22 : vector<32x1xf32>
      %c0_12 = arith.constant 0 : index
      %c0_13 = arith.constant 0 : index
      %24 = vector.load %arg6[%c0_12, %c0_13] : memref<32x1xf32, #tpu.memory_space<vmem>>, vector<32x1xf32>
      %cst_14 = arith.constant 9.99999974E-6 : f32
      %25 = vector.broadcast %cst_14 : f32 to vector<32x1xf32>
      %26 = arith.addf %23, %25 : vector<32x1xf32>
      %27 = math.rsqrt %26 : vector<32x1xf32>
      %28 = arith.mulf %24, %27 : vector<32x1xf32>
      %c0_15 = arith.constant 0 : index
      %c0_16 = arith.constant 0 : index
      %29 = vector.load %arg7[%c0_15, %c0_16] : memref<32x1xf32, #tpu.memory_space<vmem>>, vector<32x1xf32>
      %30 = arith.mulf %18, %28 : vector<32x1xf32>
      %31 = arith.subf %29, %30 : vector<32x1xf32>
      %c0_17 = arith.constant 0 : index
      %c0_18 = arith.constant 0 : index
      %32 = vector.load %arg9[%c0_17, %c0_18] : memref<32x2xf32, #tpu.memory_space<vmem>>, vector<32x1xf32>
      tpu.vector_store %arg9[%c0_17, %c0_18], %28 {strides = array<i32>} : memref<32x2xf32, #tpu.memory_space<vmem>>, vector<32x1xf32>,
      %c0_19 = arith.constant 0 : index
      %c1 = arith.constant 1 : index
      %33 = vector.load %arg9[%c0_19, %c1] : memref<32x2xf32, #tpu.memory_space<vmem>>, vector<32x1xf32>
      tpu.vector_store %arg9[%c0_19, %c1], %31 {strides = array<i32>} : memref<32x2xf32, #tpu.memory_space<vmem>>, vector<32x1xf32>,
    } else {
    }
    return
  }
  func.func @transform_0(%arg0: i32, %arg1: i32) -> (i32, i32, i32) {
    %c0_i32 = arith.constant 0 : i32
    %c0_i32_0 = arith.constant 0 : i32
    %c0_i32_1 = arith.constant 0 : i32
    return %arg1, %c0_i32, %c0_i32_0 : i32, i32, i32
  }
  func.func @transform_1(%arg0: i32, %arg1: i32) -> (i32, i32) {
    %c0_i32 = arith.constant 0 : i32
    %c0_i32_0 = arith.constant 0 : i32
    %c0_i32_1 = arith.constant 0 : i32
    return %c0_i32, %c0_i32_0 : i32, i32
  }
  func.func @transform_2(%arg0: i32, %arg1: i32) -> (i32, i32) {
    %c0_i32 = arith.constant 0 : i32
    %c0_i32_0 = arith.constant 0 : i32
    %c0_i32_1 = arith.constant 0 : i32
    return %c0_i32, %c0_i32_0 : i32, i32
  }
  func.func @transform_3(%arg0: i32, %arg1: i32) -> (i32, i32) {
    %c0_i32 = arith.constant 0 : i32
    %c0_i32_0 = arith.constant 0 : i32
    %c0_i32_1 = arith.constant 0 : i32
    return %c0_i32, %c0_i32_0 : i32, i32
  }
  func.func @transform_4(%arg0: i32, %arg1: i32) -> (i32, i32) {
    %c0_i32 = arith.constant 0 : i32
    %c0_i32_0 = arith.constant 0 : i32
    %c0_i32_1 = arith.constant 0 : i32
    return %c0_i32, %c0_i32_0 : i32, i32
  }
  func.func @transform_5(%arg0: i32, %arg1: i32) -> (i32, i32) {
    %c0_i32 = arith.constant 0 : i32
    %c0_i32_0 = arith.constant 0 : i32
    %c0_i32_1 = arith.constant 0 : i32
    return %c0_i32, %c0_i32_0 : i32, i32
  }
  func.func @transform_6(%arg0: i32, %arg1: i32) -> (i32, i32, i32) {
    %c0_i32 = arith.constant 0 : i32
    %c0_i32_0 = arith.constant 0 : i32
    %c0_i32_1 = arith.constant 0 : i32
    return %arg1, %c0_i32, %c0_i32_0 : i32, i32, i32
  }
  func.func @transform_7(%arg0: i32, %arg1: i32) -> (i32, i32) {
    %c0_i32 = arith.constant 0 : i32
    %c0_i32_0 = arith.constant 0 : i32
    %c0_i32_1 = arith.constant 0 : i32
    return %c0_i32, %c0_i32_0 : i32, i32
  }
}

</mosaic_0001>

<bundles_post_ra>
// kernel: tpu_custom_call.1
= control target key start
LH: loop header
LB: loop body
LE: loop exit
PB: predicated region body
PF: predicated region fallthrough
CT: control target
= control target key end

     0   :  { %s1261_s0 = inlined_call_operand.vmem [shape: f32[2,4,256], index: 0, kind: input, shape index: {}]   ;;  %s1262_s1 = inlined_call_operand.vmem [shape: f32[4,1], index: 1, kind: input, shape index: {}]   ;;  %s1263_s2 = inlined_call_operand.vmem [shape: f32[4,1], index: 2, kind: input, shape index: {}]   ;;  %s1264_s3 = inlined_call_operand.vmem [shape: bf16[32,4], index: 3, kind: input, shape index: {}]   ;;  %s1265_s4 = inlined_call_operand.vmem [shape: f32[32,1], index: 4, kind: input, shape index: {}]   ;;  %s1266_s5 = inlined_call_operand.vmem [shape: f32[32,1], index: 5, kind: input, shape index: {}]   ;;  %s1267_s6 = inlined_call_operand.hbm [shape: f32[2,32,256], index: 6, kind: output, shape index: {0}]   ;;  %s1268_s7 = inlined_call_operand.vmem [shape: f32[32,2], index: 7, kind: output, shape index: {1}]  }
   0x1   :  { %1270 = sst [smem:[#allocation9_spill]] %s1261_s0 }
   0x2   :  { %1271 = sst [smem:[#allocation10_spill]] %s1262_s1 }
   0x3   :  { %1272 = sst [smem:[#allocation11_spill]] %s1263_s2 }
   0x4   :  { %13 = vsyncpa [#allocation7], 0 }
   0x5   :  { %15 = vsyncpa [#allocation7 + $0x1], 0  ;;  %s1005_s24 = smov 0   ;;  %s1007_s25 = smov 0  }
   0x6   :  { %s1009_s26 = smov 0   ;;  %s1011_s27 = smov 0  }
   0x7   :  { %s1013_s28 = smov 0   ;;  %s1015_s29 = smov 0  }
   0x8   :  { %s1017_s30 = smov 0   ;;  %s1019_s8 = smov 0  }
   0x9 LB: > { %s742_s9 = sadd.s32 4294967295, %s957_s8   ;;  %s743_s10 = sadd.s32 4294967294, %s957_s8   ;;  %s957_s8 = sphi %s1019_s8, %s21_s8   ;;  %s953_s30 = sphi %s1017_s30, %s1291_s30   ;;  %s949_s29 = sphi %s1015_s29, %s1290_s29   ;;  %s945_s28 = sphi %s1013_s28, %s1289_s28   ;;  %s941_s27 = sphi %s1011_s27, %s1288_s27   ;;  %s937_s26 = sphi %s1009_s26, %s1287_s26   ;;  %s933_s25 = sphi %s1007_s25, %s1286_s25   ;;  %s929_s24 = sphi %s1005_s24, %s1285_s24  }
   0xa   : > { %s30_s11 = sadd.s32 1, %s949_s29  ;;  %s33_s12 = sadd.s32 1, %s953_s30 }
   0xb   : > { %p31_p0 = scmp.ge.s32.totalorder %s30_s11, 2  ;;  %s171_s13 = sadd.s32 1, %s937_s26 }
   0xc   : > { %p181_p1 = scmp.ne.s32.totalorder %s937_s26, %s933_s25  ;;  %p182_p2 = scmp.eq.s32.totalorder %s742_s9, 3 }
   0xd   : > { %s1293_s11 = smov (%p31_p0, %s30_s11), 0  ;;  %s1295_s12 = smov (!%p31_p0, %s33_s12), %s953_s30 }
   0xe   : > { %s168_s14 = ssub.s32 %s949_s29, %s1293_s11  ;;  %p1057_p3 = por %p182_p2, %p181_p1 }
   0xf   : > { %p35_p4 = scmp.ge.s32.totalorder %s1295_s12, 2  ;;  %p169_p5 = scmp.eq.s32.totalorder %s168_s14, 0 }
  0x10   : > { %p187_p6 = scmp.ne.s32.totalorder %s933_s25, %s929_s24  ;;  %p188_p7 = scmp.eq.s32.totalorder %s743_s10, 3 }
  0x11   : > { %s1297_s12 = smov (%p35_p4, %s1295_s12), 0  ;;  %p746_p9 = scmp.ge.s32.totalorder %s957_s8, 1 }
  0x12   : > { %s1066_s16 = scalar_select %p169_p5, %s937_s26, %s171_s13  }
  0x13   : > { %p1068_p8 = por %p188_p7, %p187_p6  ;;  %p250_p10 = scmp.lt.s32.totalorder %s957_s8, 5 }
  0x15   : > { %p251_p11 = pnand %p746_p9, %p250_p10 }
  0x16   : > { %s1269_s18 = sand.u32 (!%p251_p11), 1, %s933_s25   ;;  %p282_p12 = scmp.lt.s32.totalorder (!%p251_p11), %s941_s27, 1 }
  0x17   : > { %254 = sbr.rel (%p251_p11) target bundleno = 825 (0x339), region = 44  ;;  %s747_s19 = sshll.u32 (!%p251_p11), %s1269_s18, 6 }
  0x18   : > { %p288_p13 = scmp.eq.s32.totalorder (!%p251_p11), %s945_s28, 0  ;;  %p289_p0 = scmp.eq.s32.totalorder (!%p251_p11), %s941_s27, 0 }
  0x19   : > { %s1275_s0 = sld [smem:[#allocation9_spill]] (!%p251_p11)  ;;  %s1086_s10 = scalar_lea.vmem (!%p251_p11), [#allocation6], %s747_s19 }
  0x1a   : > { %p290_p1 = pnand (!%p251_p11), %p289_p0, %p288_p13 }
  0x1c   : > { %s283_s20 = scalar_select %p282_p12, %s941_s27, 1 }
  0x1d   : > { %293 = sbr.rel (%p290_p1) target bundleno = 45 (0x2d), region = 48 }
  0x1e   : > { %s769_s21 = sshll.u32 %s283_s20, 3 }
  0x1f   : > { %s1084_s9 = scalar_lea.vmem %s1275_s0, %s769_s21 }
  0x22   : > { %vm294_vm0 = vcmask 3072   ;;  %vm297_vm1 = vcmask 7168   ;;  %v959_v0 = vmov 0.0  }
  0x23   : > { %295 = vst.msk [vmem:[#allocation2] sm:$0xf] %vm294_vm0, %v959_v0 }
  0x24   : > { %296 = vst.msk [vmem:[#allocation3] sm:$0xf] %vm294_vm0, %v959_v0 }
  0x25   : > { %298 = vst.msk [vmem:[#allocation4] sm:$0xff] %vm297_vm1, %v959_v0 }
  0x26   : > { %299 = vst.msk [vmem:[#allocation4 + $0x8] sm:$0xff] %vm297_vm1, %v959_v0 }
  0x27   : > { %300 = vst.msk [vmem:[#allocation4 + $0x10] sm:$0xff] %vm297_vm1, %v959_v0 }
  0x28   : > { %301 = vst.msk [vmem:[#allocation4 + $0x18] sm:$0xff] %vm297_vm1, %v959_v0 }
  0x29   : > { %302 = vst.msk [vmem:[#allocation5] sm:$0xff] %vm297_vm1, %v959_v0 }
  0x2a   : > { %303 = vst.msk [vmem:[#allocation5 + $0x8] sm:$0xff] %vm297_vm1, %v959_v0 }
  0x2b   : > { %304 = vst.msk [vmem:[#allocation5 + $0x10] sm:$0xff] %vm297_vm1, %v959_v0 }
  0x2c   : > { %305 = vst.msk [vmem:[#allocation5 + $0x18] sm:$0xff] %vm297_vm1, %v959_v0 }
  0x2d PF: > { %p750_p2 = scmp.ne.s32.totalorder %s945_s28, 0 }
  0x2f   : > { %308 = sbr.rel (%p750_p2) target bundleno = 191 (0xbf), region = 52 }
  0x34   : > { %v309_v1 = vld [vmem:[%s1084_s9] sm:$0xff]  ;;  %vm317_vm2 = vcmask 1043456   ;;  %v310_v13 = vld [vmem:[#allocation2] sm:$0xf]  ;;  %vm324_vm3 = vcmask 3072  }
  0x35   : > { %312 = vst [vmem:[#allocation1] ss:$2 sm:$0xff] %v309_v1  ;;  %v327_v2 = vmul.f32 %v309_v1, %v309_v1  ;;  %v326_v16 = vld [vmem:[#allocation3] sm:$0xf] }
  0x3c   : > { %v313_v3 = vld.sshfl [vmem:[#allocation1] sm:$0xff pattern:$0x75316420]  ;;  %v314_v4 = vld.sshfl [vmem:[#allocation1 + $0x8] sm:$0xff pattern:$0x75316420] }
  0x3d   : > { %v318_v5 = vsel %vm317_vm2, %v313_v3, 0.0  ;;  %v319_v6 = vsel %vm317_vm2, %v314_v4, 0.0  ;;  %329 = vst [vmem:[#allocation1] ss:$2 sm:$0xff] %v327_v2 }
  0x3e   : > { %v320_v7 = vadd.f32 %v319_v6, %v318_v5 }
  0x40   : > { %321 = vadd.xlane.f32.xlu0 %v320_v7 }
  0x44   : > { %v330_v8 = vld.sshfl [vmem:[#allocation1] sm:$0xff pattern:$0x75316420]  ;;  %v331_v9 = vld.sshfl [vmem:[#allocation1 + $0x8] sm:$0xff pattern:$0x75316420] }
  0x45   : > { %v334_v10 = vsel %vm317_vm2, %v330_v8, 0.0  ;;  %v335_v11 = vsel %vm317_vm2, %v331_v9, 0.0 }
  0x46   : > { %v336_v12 = vadd.f32 %v335_v11, %v334_v10 }
  0x48   : > { %337 = vadd.xlane.f32.xlu0 %v336_v12 }
  0xb3   : > { %v322_v14 = vpop.xlane.xlu0 %321 }
  0xb4   : > { %v323_v15 = vadd.f32 %v322_v14, %v310_v13 }
  0xb6   : > { %325 = vst.msk [vmem:[#allocation2] sm:$0xf] %vm324_vm3, %v323_v15 }
  0xbb   : > { %v338_v17 = vpop.xlane.xlu0 %337 }
  0xbc   : > { %v339_v18 = vadd.f32 %v338_v17, %v326_v16 }
  0xbe   : > { %340 = vst.msk [vmem:[#allocation3] sm:$0xf] %vm324_vm3, %v339_v18 }
  0xbf PF: > { %p341_p4 = scmp.eq.s32.totalorder %s945_s28, 1  ;;  %p751_p5 = scmp.ne.s32.totalorder %s945_s28, 1 }
  0xc0   : > { %s1276_s1 = sld [smem:[#allocation10_spill]] (!%p751_p5) }
  0xc1   : > { %344 = sbr.rel (%p751_p5) target bundleno = 642 (0x282), region = 56  ;;  %s1277_s2 = sld [smem:[#allocation11_spill]] (!%p751_p5) }
  0xc6   : > { %v346_v19 = vld [vmem:[#allocation2] sm:$0xf]  ;;  %v348_v20 = vld [vmem:[#allocation3] sm:$0xf]  ;;  %v960_v21 = vmov 0   ;;  %v345_v44 = vld [vmem:[%s1084_s9] sm:$0xff] }
  0xc7   : > { %852 = vset.pattern.permute.xlu0 %v960_v21  ;;  %v347_v22 = vmul.f32 0.001953125, %v346_v19  ;;  %v349_v23 = vmul.f32 0.001953125, %v348_v20  ;;  %v352_v32 = vld [vmem:[%s1276_s1] sm:$0xf]  ;;  %v961_v39 = vmov 839922192  }
  0xc8   : > { %v365_v37 = vld [vmem:[%s1277_s2] sm:$0xf]  ;;  %v373_v40 = vunpack.c.l.s4 %v961_v39  ;;  %vm418_vm7 = vcmask 1041408   ;;  %v771_v57 = vld [vmem:[%s1264_s3 + $0x8] sm:$0xff]  ;;  %vm411_vm8 = vcmask 31744   ;;  %v471_v18 = vld [vmem:[#allocation4] sm:$0xff] }
  0xc9   : > { %v350_v24 = vmul.f32 %v347_v22, %v347_v22  ;;  %v770_v56 = vld [vmem:[%s1264_s3] sm:$0xff]  ;;  %vm491_vm9 = vcmask 7168   ;;  %v496_v20 = vld [vmem:[#allocation5] sm:$0xff] }
  0xca   : > { %v374_v42 = vunpack.c.0.s8 %v373_v40 }
  0xcb   : > { %v351_v25 = vsub.f32 %v349_v23, %v350_v24  ;;  %v473_v24 = vld [vmem:[#allocation4 + $0x10] sm:$0xff] }
  0xcd   : > { %v353_v26 = vadd.f32 1e-05, %v351_v25 }
  0xcf   : > { %853 = vrsqrt.f32 %v353_v26  ;;  %vm360_vm4 = vweird.f32 %v353_v26 }
  0xd5   : > { %v854_v27 = vpop.eup %853 }
  0xd6   : > { %v355_v28 = vmul.f32 %v854_v27, %v353_v26  ;;  %vm361_vm5 = vweird.f32 %v854_v27  ;;  %v472_v26 = vld [vmem:[#allocation4 + $0x8] sm:$0xff] }
  0xd7   : > { %vm362_vm6 = vmor %vm360_vm4, %vm361_vm5 }
  0xd8   : > { %v356_v29 = vmul.f32 %v854_v27, %v355_v28 }
  0xda   : > { %v357_v30 = vmul.f32 0.5, %v356_v29 }
  0xdc   : > { %v358_v31 = vsub.f32 1.5, %v357_v30  ;;  %v474_v30 = vld [vmem:[#allocation4 + $0x18] sm:$0xff] }
  0xde   : > { %v359_v33 = vmul.f32 %v854_v27, %v358_v31 }
  0xe0   : > { %v363_v34 = vsel %vm362_vm6, %v854_v27, %v359_v33 }
  0xe1   : > { %v364_v35 = vmul.f32 %v363_v34, %v352_v32  ;;  %v497_v32 = vld [vmem:[#allocation5 + $0x8] sm:$0xff] }
  0xe3   : > { %370 = vperm.xlu0 %852, %v364_v35   ;;  %v366_v36 = vmul.f32 %v364_v35, %v347_v22 }
  0xe5   : > { %v367_v38 = vsub.f32 %v365_v37, %v366_v36  ;;  %v498_v36 = vld [vmem:[#allocation5 + $0x10] sm:$0xff] }
  0xeb   : > { %380 = vperm.xlu0 %852, %v367_v38   ;;  %v499_v38 = vld [vmem:[#allocation5 + $0x18] sm:$0xff] }
 0x155   : > { %v371_v41 = vpop.permute.xlu0 %370 }
 0x156   : > { %v375_v43 = vperm.slane %v371_v41, %v374_v42 }
 0x158   : > { %v377_v46 = vmul.f32 %v375_v43, %v345_v44 }
 0x15d   : > { %v381_v45 = vpop.permute.xlu0 %380 }
 0x15e   : > { %v385_v47 = vperm.slane %v381_v45, %v374_v42 }
 0x160   : > { %v387_v48 = vadd.f32 %v385_v47, %v377_v46 }
 0x162   : > { %v388_v49 = vmax.f32 %v387_v48, 0.0 }
 0x164   : > { %394 = vst [vmem:[#allocation1] ss:$2 sm:$0xff] %v388_v49 }
 0x16b   : > { %v395_v50 = vld.sshfl [vmem:[#allocation1] sm:$0xff pattern:$0x75316420]  ;;  %v396_v51 = vld.sshfl [vmem:[#allocation1 + $0x8] sm:$0xff pattern:$0x75316420] }
 0x16c   : > { %v399_v52 = vpack.c.bf16 %v395_v50, %v395_v50  ;;  %v400_v53 = vpack.c.bf16 %v396_v51, %v396_v51 }
 0x16e   : > { %v420_v54 = vsel %vm418_vm7, %v399_v52, 0  ;;  %v423_v55 = vsel %vm418_vm7, %v400_v53, 0 }
 0x16f   : > { %432 = vmatpush.bf16.msra.mxu0 %v420_v54  ;;  %773 = vmatpush.bf16.msra.mxu2 %v420_v54 }
 0x170   : > { %451 = vmatpush.bf16.msra.mxu1 %v423_v55  ;;  %774 = vmatpush.bf16.msra.mxu3 %v423_v55 }
 0x172   : > { %760 = vmatmul.msk.bf16.vlgmr.msra.gmra.mxu0 %vm411_vm8, %v770_v56  ;;  %761 = vmatmul.msk.bf16.vlgmr.msra.gmra.mxu2 %vm411_vm8, %v771_v57 }
 0x173   : > { %762 = vmatmul.msk.bf16.vlgmr.msra.gmra.mxu1 %vm411_vm8, %v770_v56  ;;  %763 = vmatmul.msk.bf16.vlgmr.msra.gmra.mxu3 %vm411_vm8, %v771_v57 }
 0x1ef   : > { %v434_v58 = vpop.f32.mrf.mxu0 }
 0x1f0   : > { %463 = vst [vmem:[%s1086_s10] sm:$0xff] %v434_v58  ;;  %v453_v59 = vpop.f32.mrf.mxu1  ;;  %v500_v60 = vmul.f32 %v434_v58, %v434_v58 }
 0x1f1   : > { %464 = vst [vmem:[%s1086_s10 + $0x8] sm:$0xff] %v453_v59  ;;  %v475_v61 = vadd.f32 %v453_v59, %v434_v58  ;;  %v501_v62 = vmul.f32 %v453_v59, %v453_v59 }
 0x1f3   : > { %476 = vadd.xlane.f32.xlu1 %v475_v61  ;;  %v508_v63 = vadd.f32 %v501_v62, %v500_v60 }
 0x1f5   : > { %509 = vadd.xlane.f32.xlu0 %v508_v63  ;;  %v439_v0 = vpop.f32.mrf.mxu2 }
 0x1f6   : > { %467 = vst [vmem:[%s1086_s10 + $0x20] sm:$0xff] %v439_v0  ;;  %v458_v1 = vpop.f32.mrf.mxu3  ;;  %v504_v12 = vmul.f32 %v439_v0, %v439_v0 }
 0x1f7   : > { %468 = vst [vmem:[%s1086_s10 + $0x28] sm:$0xff] %v458_v1  ;;  %v436_v2 = vpop.f32.mrf.mxu0  ;;  %v481_v3 = vadd.f32 %v458_v1, %v439_v0  ;;  %v505_v13 = vmul.f32 %v458_v1, %v458_v1 }
 0x1f8   : > { %465 = vst [vmem:[%s1086_s10 + $0x10] sm:$0xff] %v436_v2  ;;  %v455_v4 = vpop.f32.mrf.mxu1  ;;  %v502_v6 = vmul.f32 %v436_v2, %v436_v2 }
 0x1f9   : > { %466 = vst [vmem:[%s1086_s10 + $0x18] sm:$0xff] %v455_v4  ;;  %482 = vadd.xlane.f32.xlu2 %v481_v3  ;;  %v478_v5 = vadd.f32 %v455_v4, %v436_v2  ;;  %v503_v7 = vmul.f32 %v455_v4, %v455_v4  ;;  %v514_v16 = vadd.f32 %v505_v13, %v504_v12 }
 0x1fb   : > { %479 = vadd.xlane.f32.xlu1 %v478_v5  ;;  %v511_v11 = vadd.f32 %v503_v7, %v502_v6 }
 0x1fd   : > { %v441_v8 = vpop.f32.mrf.mxu2 }
 0x1fe   : > { %469 = vst [vmem:[%s1086_s10 + $0x30] sm:$0xff] %v441_v8  ;;  %v460_v9 = vpop.f32.mrf.mxu3  ;;  %v506_v14 = vmul.f32 %v441_v8, %v441_v8 }
 0x1ff   : > { %470 = vst [vmem:[%s1086_s10 + $0x38] sm:$0xff] %v460_v9  ;;  %v484_v10 = vadd.f32 %v460_v9, %v441_v8  ;;  %v507_v15 = vmul.f32 %v460_v9, %v460_v9 }
 0x201   : > { %485 = vadd.xlane.f32.xlu2 %v484_v10  ;;  %v517_v17 = vadd.f32 %v507_v15, %v506_v14 }
 0x203   : > { %512 = vadd.xlane.f32.xlu1 %v511_v11 }
 0x209   : > { %515 = vadd.xlane.f32.xlu2 %v514_v16 }
 0x20b   : > { %518 = vadd.xlane.f32.xlu1 %v517_v17 }
 0x266   : > { %v477_v19 = vpop.xlane.xlu1 %476 }
 0x267   : > { %v487_v21 = vadd.f32 %v477_v19, %v471_v18 }
 0x268   : > { %v510_v22 = vpop.xlane.xlu0 %509 }
 0x269   : > { %492 = vst.msk [vmem:[#allocation4] sm:$0xff] %vm491_vm9, %v487_v21  ;;  %v520_v23 = vadd.f32 %v510_v22, %v496_v20 }
 0x26b   : > { %524 = vst.msk [vmem:[#allocation5] sm:$0xff] %vm491_vm9, %v520_v23 }
 0x26c   : > { %v483_v25 = vpop.xlane.xlu2 %482 }
 0x26d   : > { %v489_v27 = vadd.f32 %v483_v25, %v473_v24 }
 0x26e   : > { %v480_v28 = vpop.xlane.xlu1 %479 }
 0x26f   : > { %494 = vst.msk [vmem:[#allocation4 + $0x10] sm:$0xff] %vm491_vm9, %v489_v27  ;;  %v488_v29 = vadd.f32 %v480_v28, %v472_v26 }
 0x271   : > { %493 = vst.msk [vmem:[#allocation4 + $0x8] sm:$0xff] %vm491_vm9, %v488_v29 }
 0x274   : > { %v486_v31 = vpop.xlane.xlu2 %485 }
 0x275   : > { %v490_v33 = vadd.f32 %v486_v31, %v474_v30 }
 0x276   : > { %v513_v34 = vpop.xlane.xlu1 %512 }
 0x277   : > { %495 = vst.msk [vmem:[#allocation4 + $0x18] sm:$0xff] %vm491_vm9, %v490_v33  ;;  %v521_v35 = vadd.f32 %v513_v34, %v497_v32 }
 0x279   : > { %525 = vst.msk [vmem:[#allocation5 + $0x8] sm:$0xff] %vm491_vm9, %v521_v35 }
 0x27c   : > { %v516_v37 = vpop.xlane.xlu2 %515 }
 0x27d   : > { %v522_v39 = vadd.f32 %v516_v37, %v498_v36 }
 0x27e   : > { %v519_v40 = vpop.xlane.xlu1 %518 }
 0x27f   : > { %526 = vst.msk [vmem:[#allocation5 + $0x10] sm:$0xff] %vm491_vm9, %v522_v39  ;;  %v523_v41 = vadd.f32 %v519_v40, %v499_v38 }
 0x281   : > { %527 = vst.msk [vmem:[#allocation5 + $0x18] sm:$0xff] %vm491_vm9, %v523_v41 }
 0x282 PF: > { %p528_p6 = scmp.eq.s32.totalorder %s941_s27, 1 }
 0x284   : > { %p529_p7 = pnand %p528_p6, %p341_p4 }
 0x285   : > { %s962_s28 = smov (!%p529_p7), 1  }
 0x286   : > { %532 = sbr.rel (%p529_p7) target bundleno = 809 (0x329), region = 60 }
 0x28b   : > { %v535_v42 = vld [vmem:[#allocation4 + $0x10] sm:$0xff]  ;;  %v533_v46 = vld [vmem:[#allocation4] sm:$0xff]  ;;  %v536_v50 = vld [vmem:[#allocation4 + $0x18] sm:$0xff]  ;;  %vm621_vm5 = vcmask 7168   ;;  %vm642_vm7 = vcmask 15368  }
 0x28c   : > { %v543_v43 = vld [vmem:[#allocation5 + $0x10] sm:$0xff]  ;;  %v1124_v44 = vmul.f32 0.001953125, %v535_v42  ;;  %v541_v47 = vld [vmem:[#allocation5] sm:$0xff]  ;;  %v1126_v48 = vmul.f32 0.001953125, %v533_v46  ;;  %v1130_v52 = vmul.f32 0.001953125, %v536_v50  ;;  %v544_v53 = vld [vmem:[#allocation5 + $0x18] sm:$0xff] }
 0x28d   : > { %v547_v45 = vmul.f32 0.001953125, %v543_v43  ;;  %v545_v49 = vmul.f32 0.001953125, %v541_v47  ;;  %v548_v55 = vmul.f32 0.001953125, %v544_v53  ;;  %v534_v56 = vld [vmem:[#allocation4 + $0x8] sm:$0xff]  ;;  %v559_v24 = vld [vmem:[%s1265_s4 + $0x10] sm:$0xff]  ;;  %v557_v29 = vld [vmem:[%s1265_s4] sm:$0xff] }
 0x28e   : > { %v551_v51 = vmul.f32 %v1124_v44, %v1124_v44  ;;  %v549_v54 = vmul.f32 %v1126_v48, %v1126_v48  ;;  %v542_v57 = vld [vmem:[#allocation5 + $0x8] sm:$0xff]  ;;  %v552_v59 = vmul.f32 %v1130_v52, %v1130_v52  ;;  %v1136_v60 = vmul.f32 0.001953125, %v534_v56  ;;  %v611_v38 = vld [vmem:[%s1266_s5 + $0x10] sm:$0xff]  ;;  %v558_v41 = vld [vmem:[%s1265_s4 + $0x8] sm:$0xff] }
 0x28f   : > { %v546_v61 = vmul.f32 0.001953125, %v542_v57  ;;  %v560_v33 = vld [vmem:[%s1265_s4 + $0x18] sm:$0xff] }
 0x290   : > { %v555_v58 = vsub.f32 %v547_v45, %v551_v51  ;;  %v553_v62 = vsub.f32 %v545_v49, %v549_v54  ;;  %v556_v0 = vsub.f32 %v548_v55, %v552_v59  ;;  %v550_v1 = vmul.f32 %v1136_v60, %v1136_v60  ;;  %v609_v45 = vld [vmem:[%s1266_s5] sm:$0xff]  ;;  %v610_v55 = vld [vmem:[%s1266_s5 + $0x8] sm:$0xff] }
 0x292   : > { %v563_v63 = vadd.f32 1e-05, %v555_v58  ;;  %v561_v2 = vadd.f32 1e-05, %v553_v62  ;;  %v564_v3 = vadd.f32 1e-05, %v556_v0  ;;  %v554_v4 = vsub.f32 %v546_v61, %v550_v1 }
 0x294   : > { %855 = vrsqrt.f32 %v563_v63  ;;  %v562_v5 = vadd.f32 1e-05, %v554_v4  ;;  %vm591_vm10 = vweird.f32 %v563_v63  ;;  %vm571_vm12 = vweird.f32 %v561_v2 }
 0x295   : > { %857 = vrsqrt.f32 %v561_v2  ;;  %vm601_vm14 = vweird.f32 %v564_v3 }
 0x296   : > { %859 = vrsqrt.f32 %v564_v3  ;;  %vm581_vm1 = vweird.f32 %v562_v5 }
 0x297   : > { %861 = vrsqrt.f32 %v562_v5 }
 0x29a   : > { %v856_v6 = vpop.eup %855 }
 0x29b   : > { %v858_v7 = vpop.eup %857  ;;  %v586_v8 = vmul.f32 %v856_v6, %v563_v63  ;;  %vm592_vm11 = vweird.f32 %v856_v6 }
 0x29c   : > { %v860_v9 = vpop.eup %859  ;;  %v566_v10 = vmul.f32 %v858_v7, %v561_v2  ;;  %vm572_vm13 = vweird.f32 %v858_v7  ;;  %vm1140_vm0 = vmor %vm591_vm10, %vm592_vm11 }
 0x29d   : > { %v587_v11 = vmul.f32 %v856_v6, %v586_v8  ;;  %v596_v12 = vmul.f32 %v860_v9, %v564_v3  ;;  %v862_v13 = vpop.eup %861  ;;  %vm602_vm15 = vweird.f32 %v860_v9  ;;  %vm1147_vm2 = vmor %vm571_vm12, %vm572_vm13 }
 0x29e   : > { %v567_v14 = vmul.f32 %v858_v7, %v566_v10  ;;  %v576_v17 = vmul.f32 %v862_v13, %v562_v5  ;;  %vm582_vm3 = vweird.f32 %v862_v13  ;;  %vm1155_vm4 = vmor %vm601_vm14, %vm602_vm15 }
 0x29f   : > { %v588_v15 = vmul.f32 0.5, %v587_v11  ;;  %v597_v16 = vmul.f32 %v860_v9, %v596_v12  ;;  %vm583_vm6 = vmor %vm581_vm1, %vm582_vm3 }
 0x2a0   : > { %v568_v18 = vmul.f32 0.5, %v567_v14  ;;  %v577_v21 = vmul.f32 %v862_v13, %v576_v17 }
 0x2a1   : > { %v589_v19 = vsub.f32 1.5, %v588_v15  ;;  %v598_v20 = vmul.f32 0.5, %v597_v16 }
 0x2a2   : > { %v569_v23 = vsub.f32 1.5, %v568_v18  ;;  %v578_v28 = vmul.f32 0.5, %v577_v21 }
 0x2a3   : > { %v590_v25 = vmul.f32 %v856_v6, %v589_v19  ;;  %v599_v27 = vsub.f32 1.5, %v598_v20 }
 0x2a4   : > { %v570_v30 = vmul.f32 %v858_v7, %v569_v23  ;;  %v579_v35 = vsub.f32 1.5, %v578_v28 }
 0x2a5   : > { %v594_v32 = vsel %vm1140_vm0, %v856_v6, %v590_v25  ;;  %v600_v34 = vmul.f32 %v860_v9, %v599_v27 }
 0x2a6   : > { %v607_v36 = vmul.f32 %v594_v32, %v559_v24  ;;  %v574_v37 = vsel %vm1147_vm2, %v858_v7, %v570_v30  ;;  %v580_v42 = vmul.f32 %v862_v13, %v579_v35 }
 0x2a7   : > { %v605_v39 = vmul.f32 %v574_v37, %v557_v29  ;;  %v604_v40 = vsel %vm1155_vm4, %v860_v9, %v600_v34 }
 0x2a8   : > { %v615_v43 = vmul.f32 %v607_v36, %v1124_v44  ;;  %v608_v46 = vmul.f32 %v604_v40, %v560_v33  ;;  %624 = vst.msk [vmem:[%s1268_s7 + $0x10] sm:$0xff] %vm621_vm5, %v607_v36  ;;  %v584_v49 = vsel %vm583_vm6, %v862_v13, %v580_v42 }
 0x2a9   : > { %v613_v47 = vmul.f32 %v605_v39, %v1126_v48  ;;  %622 = vst.msk [vmem:[%s1268_s7] sm:$0xff] %vm621_vm5, %v605_v39  ;;  %v606_v44 = vmul.f32 %v584_v49, %v558_v41  ;;  %v612_v48 = vld [vmem:[%s1266_s5 + $0x18] sm:$0xff] }
 0x2aa   : > { %v619_v50 = vsub.f32 %v611_v38, %v615_v43  ;;  %625 = vst.msk [vmem:[%s1268_s7 + $0x18] sm:$0xff] %vm621_vm5, %v608_v46  ;;  %v616_v53 = vmul.f32 %v608_v46, %v1130_v52 }
 0x2ab   : > { %v617_v51 = vsub.f32 %v609_v45, %v613_v47  ;;  %623 = vst.msk [vmem:[%s1268_s7 + $0x8] sm:$0xff] %vm621_vm5, %v606_v44  ;;  %v614_v54 = vmul.f32 %v606_v44, %v1136_v60 }
 0x2ac   : > { %634 = vrot.lane.b32.xlu1 %v619_v50, %s962_s28  ;;  %v620_v56 = vsub.f32 %v612_v48, %v616_v53 }
 0x2ad   : > { %630 = vrot.lane.b32.xlu0 %v617_v51, %s962_s28  ;;  %v618_v57 = vsub.f32 %v610_v55, %v614_v54 }
 0x2b4   : > { %636 = vrot.lane.b32.xlu1 %v620_v56, %s962_s28 }
 0x2b5   : > { %632 = vrot.lane.b32.xlu0 %v618_v57, %s962_s28 }
 0x31e   : > { %v635_v52 = vpop.permute.xlu1 %634 }
 0x31f   : > { %645 = vst.msk [vmem:[%s1268_s7 + $0x10] sm:$0xff] %vm642_vm7, %v635_v52  ;;  %v631_v58 = vpop.permute.xlu0 %630 }
 0x320   : > { %643 = vst.msk [vmem:[%s1268_s7] sm:$0xff] %vm642_vm7, %v631_v58 }
 0x326   : > { %v637_v59 = vpop.permute.xlu1 %636 }
 0x327   : > { %646 = vst.msk [vmem:[%s1268_s7 + $0x18] sm:$0xff] %vm642_vm7, %v637_v59  ;;  %v633_v60 = vpop.permute.xlu0 %632 }
 0x328   : > { %644 = vst.msk [vmem:[%s1268_s7 + $0x8] sm:$0xff] %vm642_vm7, %v633_v60 }
 0x329 PF: > { %s772_s28 = sshll.u32 %s941_s27, 6  ;;  %s660_s14 = sshll.u32 %s1086_s10, 4  ;;  %s661_s14 = int_to_ptr.vmem [resolvable:$true] %s660_s14 }
 0x32a   : > { %s659_s13 = scalar_lea.hbm %s1267_s6, %s772_s28  ;;  %s1284_s19 = sand.u32 1, %s933_s25  }
 0x32b   : > { %s662_s18 = sshll.u32 %s659_s13, 4  ;;  %s648_s20 = scalar_lea.sflag [#allocation7], %s1284_s19  ;;  %s663_s18 = int_to_ptr.hbm [resolvable:$true] %s662_s18 }
 0x32c   : > { %s877_s0 = sshra.s32 %s663_s18, 4  ;;  %s883_s27 = scalar_lea.hbm %s1267_s6, 128  ;;  %s878_s0 = int_to_ptr.hbm [resolvable:$true] %s877_s0 }
 0x32d   : > { %s879_s21 = scalar_lea.hbm %s878_s0, 64  ;;  %p884_p12 = scmp.lt.s32.totalorder %s878_s0, %s1267_s6 }
 0x32e   : > { %p880_p9 = scmp.ne.s32.totalorder %s878_s0, %s879_s21  ;;  %p885_p13 = scmp.lt.s32.totalorder %s883_s27, %s879_s21 }
 0x330   : > { %p881_p10 = pnand %p880_p9, %p1057_p3  ;;  %p886_p0 = por %p885_p13, %p884_p12 }
 0x332   : > { %p882_p11 = pneg %p881_p10 }
 0x334   : > { %p887_p1 = pnand %p886_p0, %p882_p11 }
 0x336   : > { %890 = shalt.err (!%p887_p1)
}
 0x337   : > { %s963_s10 = smov 256   ;;  %s964_s28 = smov 16  }
 0x338   : > { %775 = dma.vmem_to_hbm [thread:$0]  (%p1057_p3), %s661_s14, 1024, %s663_s18, %s648_s20, %s963_s10, %s963_s10, %s964_s28  }
 0x339 PF: > { %p781_p2 = scmp.ge.s32.totalorder %s957_s8, 2  ;;  %s683_s1 = sand.u32 1, %s929_s24  }
 0x33a   : > { %s684_s2 = scalar_lea.sflag [#allocation7], %s683_s1 }
 0x33b   : > { %p778_p4 = pnand %p781_p2, %p1068_p8 }
 0x33d   : > { %p779_p5 = pneg %p778_p4 }
 0x33f   : > { %924 = dma.done.wait (%p779_p5), %s684_s2, 1024  }
 0x340   : > { %926 = vsyncadd (%p779_p5), %s684_s2, 4294966272  ;;  %s21_s8 = sadd.s32 1, %s957_s8   ;;  %s1285_s24 = smov %s933_s25 }
 0x341   : > { %p18_p6 = scmp.ge.s32.totalorder %s21_s8, 6   ;;  %s1286_s25 = smov %s937_s26 }
 0x342   : > { %s1287_s26 = smov %s1066_s16  ;;  %s1288_s27 = smov %s949_s29 }
 0x343   : > { %s1289_s28 = smov %s953_s30  ;;  %s1290_s29 = smov %s1293_s11 }
 0x344   : > { %s1291_s30 = smov %s1297_s12  ;;  %20 = sbr.rel (!%p18_p6) target bundleno = 9 (0x9), region = 103 }
 0x349   :  { %690 = vsyncpa [#allocation7], 1 }
 0x34a   :  { %692 = vsyncpa [#allocation7 + $0x1], 1 }

</bundles_post_ra>
